<compile_context>
chip_gen: v6e
topology: v6e:2x2x1
jax: 0.10.0
libtpu: 0.0.40
codegen_flags: <defaults>
</compile_context>

<pallas_src>
import jax
import jax.numpy as jnp
from jax.experimental import pallas as pl
from jax.experimental.pallas import tpu as pltpu


_LANE = 128


# --------------------------------------------------------------------------
# Helpers: rounding, divisor search, generation-aware VMEM budgets.
# --------------------------------------------------------------------------
def _round_up(x, m):
    return (x + m - 1) // m * m


def _largest_divisor_leq(total, cap, multiple):
    """Largest d <= cap with d % multiple == 0 and total % d == 0 (None if none)."""
    cap = min(cap, total)
    best = None
    d = multiple
    while d <= cap:
        if total % d == 0:
            best = d
        d += multiple
    return best


def _vmem_budgets():
    """(vmem_limit_bytes, pass2_tile_budget, pass1_tile_budget), generation-aware."""
    vmem_bytes = None
    try:
        info = pltpu.get_tpu_info()
        vmem_bytes = getattr(info, "vmem_capacity_bytes", None)
    except Exception:
        vmem_bytes = None
    if vmem_bytes is None:
        vmem_bytes = 64 * 1024 * 1024          # assume the smallest (v7x-like) part
    if vmem_bytes >= 100 * 1024 * 1024:        # v5e / v6e: 128 MiB physical VMEM
        return 96 * 1024 * 1024, 24 * 1024 * 1024, 48 * 1024 * 1024
    # v7x: 64 MiB physical -> stay within the safe 32 MiB scoped limit
    return 32 * 1024 * 1024, 10 * 1024 * 1024, 16 * 1024 * 1024


# --------------------------------------------------------------------------
# Pass 1: K-shifted first/second moments of y = x @ W over lane-packed rows.
# --------------------------------------------------------------------------
def _pfn_stats_kernel(x_ref, w_ref, k_ref, sum_ref, sq_ref):
    # x_ref:   (tile_rows_pk, pack*C_in)    pack input rows folded into lanes
    # w_ref:   (pack*C_in, pack*C_half)     block-diagonal replication of W (resident)
    # k_ref:   (1, pack*C_half)             shift K = y(row 0), tiled pack times (f32)
    # sum/sq:  (1, 1, pack*C_half)          f32 accumulators (one block per split)
    @pl.when(pl.program_id(1) == 0)
    def _():
        sum_ref[...] = jnp.zeros_like(sum_ref)
        sq_ref[...] = jnp.zeros_like(sq_ref)

    y = jnp.dot(x_ref[...], w_ref[...], preferred_element_type=jnp.float32)
    d = y - k_ref[...]                      # shifted -> no mean/variance cancellation
    sum_ref[...] += jnp.sum(d, axis=0, keepdims=True)[None]
    sq_ref[...] += jnp.sum(d * d, axis=0, keepdims=True)[None]


# --------------------------------------------------------------------------
# Pass 2: y = relu(x @ (W*scale) + shift); out = concat([y, max_p y], -1).
# --------------------------------------------------------------------------
def _pfn_apply_kernel(x_ref, w_ref, shift_ref, out_ref):
    # x_ref:     (tile_n * P, C_in)   rows ordered (voxel, point), point fastest
    # w_ref:     (C_in, C_half)       BN scale folded into the weight (resident)
    # shift_ref: (1, C_half)          fused BN shift (resident, f32)
    # out_ref:   (tile_n, P, 2*C_half)
    tile_n, p, two_c = out_ref.shape
    c_half = two_c // 2

    y = jnp.dot(x_ref[...], w_ref[...], preferred_element_type=jnp.float32)
    y = jnp.maximum(y + shift_ref[...], 0.0)          # fused BN shift + ReLU (f32)

    y3 = y.reshape(tile_n, p, c_half)                 # leading-dim split only (cheap)
    y_max = jnp.max(y3, axis=1, keepdims=True)        # per-voxel max over points

    out_ref[:, :, :c_half] = y3.astype(out_ref.dtype)
    out_ref[:, :, c_half:] = jnp.broadcast_to(
        y_max, (tile_n, p, c_half)).astype(out_ref.dtype)


# --------------------------------------------------------------------------
# Wrapper.
# --------------------------------------------------------------------------
def pfn_layer_forward(inputs, weight, gamma, beta, *, eps=1e-3,
                      compute_dtype=jnp.bfloat16, out_dtype=None,
                      tile_n=None, tile_rows=None):
    """PFNLayer forward (use_norm=True, last_layer=False).

    inputs: (N, P, C_in); weight: (C_in, C_half) (transposed vs nn.Linear);
    gamma/beta: (C_half,).  Returns (N, P, 2*C_half) in `out_dtype`
    (defaults to `compute_dtype`, bf16).
    """
    N, P, C_in = inputs.shape
    c_in_w, C_half = weight.shape
    assert c_in_w == C_in, (c_in_w, C_in)
    compute_dtype = jnp.dtype(compute_dtype)
    out_dtype = compute_dtype if out_dtype is None else jnp.dtype(out_dtype)
    n_true = N * P

    vmem_limit, apply_budget, stats_budget = _vmem_budgets()
    x_item = compute_dtype.itemsize
    out_item = jnp.dtype(out_dtype).itemsize

    # ---- pass-2 voxel tile: lane-padding-aware VMEM budget ------------------
    per_voxel = (2 * P * _round_up(C_in, _LANE) * x_item          # x, double-buffered
                 + 2 * P * _round_up(2 * C_half, _LANE) * out_item  # out, double-buffered
                 + 2 * P * _round_up(C_half, _LANE) * 4)            # f32 y + epilogue temps
    cap_n = max(8, (apply_budget // per_voxel) // 8 * 8)
    if tile_n is None or tile_n < 8 or tile_n % 8 != 0:
        d = _largest_divisor_leq(N, cap_n, 8)
        # prefer a large exact divisor (no padding); otherwise pad N up to a tile
        tile_n = d if (d is not None and 2 * d >= cap_n) else min(cap_n, _round_up(N, 8))
    N_pad = _round_up(N, tile_n)

    # ---- pad with a replicated real point so BN stats stay exact ------------
    if N_pad != N:
        fill = jnp.broadcast_to(inputs[:1, :1, :], (N_pad - N, P, C_in))
        inputs_p = jnp.concatenate([inputs, fill.astype(inputs.dtype)], axis=0)
    else:
        inputs_p = inputs
    x2d = inputs_p.reshape(N_pad * P, C_in).astype(compute_dtype)  # shared by both passes
    n_rows_pad = N_pad * P

    # ---- pass-1 lane packing: fold `pack` rows into the lane dim ------------
    pack = _LANE // C_in if (_LANE % C_in == 0) else (8 if C_in < _LANE else 1)
    while pack > 1 and n_rows_pad % pack != 0:
        pack //= 2
    n_rows_pk = n_rows_pad // pack
    x_pk = x2d.reshape(n_rows_pk, pack * C_in)                     # free reshape

    w32 = weight.astype(jnp.float32)
    w_pack = jnp.kron(jnp.eye(pack, dtype=jnp.float32), w32).astype(compute_dtype)
    x0 = inputs.reshape(n_true, C_in)[0:1].astype(jnp.float32)
    k_row = jnp.dot(x0, w32, precision="highest")                  # (1, C_half) f32
    k_pack = jnp.tile(k_row, (1, pack))                            # (1, pack*C_half)

    # ---- pass-1 row tile + 2-way split (megacore-shards on v7x) -------------
    per_row = (2 * _round_up(pack * C_in, _LANE) * x_item          # x, double-buffered
               + 4 * _round_up(pack * C_half, _LANE) * 4)          # y / d / d^2 f32 temps
    cap_r = max(8, (stats_budget // per_row) // 8 * 8)

    splits = 2 if (n_rows_pk % 2 == 0 and n_rows_pk >= 16) else 1
    per_split = n_rows_pk // splits
    tile_rows_pk = None
    if tile_rows is not None:
        cand = (int(tile_rows) // pack) // 8 * 8
        if cand >= 8 and per_split % cand == 0:
            tile_rows_pk = cand
    if tile_rows_pk is None:
        tile_rows_pk = _largest_divisor_leq(per_split, cap_r, 8)
    if tile_rows_pk is None:
        splits = 1
        per_split = n_rows_pk
        tile_rows_pk = _largest_divisor_leq(per_split, cap_r, 8) or per_split
    steps = per_split // tile_rows_pk

    sum_d, sum_d2 = pl.pallas_call(
        _pfn_stats_kernel,
        out_shape=(jax.ShapeDtypeStruct((splits, 1, pack * C_half), jnp.float32),
                   jax.ShapeDtypeStruct((splits, 1, pack * C_half), jnp.float32)),
        grid_spec=pltpu.PrefetchScalarGridSpec(
            num_scalar_prefetch=0,
            grid=(splits, steps),
            in_specs=[
                pl.BlockSpec((tile_rows_pk, pack * C_in),
                             lambda c, i: (c * steps + i, 0)),
                pl.BlockSpec((pack * C_in, pack * C_half), lambda c, i: (0, 0)),
                pl.BlockSpec((1, pack * C_half), lambda c, i: (0, 0)),
            ],
            out_specs=[pl.BlockSpec((1, 1, pack * C_half), lambda c, i: (c, 0, 0)),
                       pl.BlockSpec((1, 1, pack * C_half), lambda c, i: (c, 0, 0))],
        ),
        compiler_params=pltpu.CompilerParams(
            dimension_semantics=("parallel", "arbitrary"),
            vmem_limit_bytes=vmem_limit),
    )(x_pk, w_pack, k_pack)

    # ---- fold stats; build the fused BN affine once (hoisted) ---------------
    sd = jnp.sum(sum_d, axis=(0, 1)).reshape(pack, C_half).sum(axis=0)
    sd2 = jnp.sum(sum_d2, axis=(0, 1)).reshape(pack, C_half).sum(axis=0)
    inv_n = jnp.float32(1.0) / jnp.float32(n_true)   # true rows; padded rows have d ~= 0
    mean_d = sd * inv_n
    mean_y = k_row[0] + mean_d
    var = jnp.maximum(sd2 * inv_n - mean_d * mean_d, 0.0)   # biased var (BN forward)
    g32 = gamma.astype(jnp.float32).reshape(C_half)
    b32 = beta.astype(jnp.float32).reshape(C_half)
    scale = g32 * jax.lax.rsqrt(var + jnp.float32(eps))
    shift = (b32 - mean_y * scale).reshape(1, C_half).astype(jnp.float32)
    w_scaled = (w32 * scale[None, :]).astype(compute_dtype)  # fold BN scale into W

    # ---- pass 2: matmul + add/ReLU + per-voxel max + concat halves ----------
    out_p = pl.pallas_call(
        _pfn_apply_kernel,
        out_shape=jax.ShapeDtypeStruct((N_pad, P, 2 * C_half), out_dtype),
        grid_spec=pltpu.PrefetchScalarGridSpec(
            num_scalar_prefetch=0,
            grid=(N_pad // tile_n,),
            in_specs=[
                pl.BlockSpec((tile_n * P, C_in), lambda i: (i, 0)),
                pl.BlockSpec((C_in, C_half), lambda i: (0, 0)),    # resident
                pl.BlockSpec((1, C_half), lambda i: (0, 0)),       # resident
            ],
            out_specs=pl.BlockSpec((tile_n, P, 2 * C_half), lambda i: (i, 0, 0)),
        ),
        compiler_params=pltpu.CompilerParams(
            dimension_semantics=("parallel",),
            vmem_limit_bytes=vmem_limit),
    )(x2d, w_scaled, shift)

    return out_p if N_pad == N else out_p[:N]


# --------------------------------------------------------------------------
# Plain-JAX reference mirroring the PyTorch forward.
# --------------------------------------------------------------------------
def pfn_layer_reference(inputs, weight, gamma, beta, eps=1e-3):
    y = jnp.einsum("npc,cd->npd", inputs.astype(jnp.float32),
                   weight.astype(jnp.float32), precision="highest")
    y2 = y.reshape(-1, y.shape[-1])
    mean = jnp.mean(y2, axis=0)
    var = jnp.mean((y2 - mean) ** 2, axis=0)
    y = (y - mean) * jax.lax.rsqrt(var + eps) * gamma.astype(jnp.float32) \
        + beta.astype(jnp.float32)
    y = jnp.maximum(y, 0.0)
    y_max = jnp.max(y, axis=1, keepdims=True)
    return jnp.concatenate([y, jnp.broadcast_to(y_max, y.shape)], axis=-1)


if __name__ == "__main__":
    # PFNLayer(in_channels=16, out_channels=64, use_norm=True, last_layer=False)
    #  -> internal C_half = 64 // 2 = 32, output channels = 64.
    N, P, C_in, out_channels = 256, 16, 16, 64
    C_half = out_channels // 2

    key = jax.random.PRNGKey(0)
    k_x, k_w = jax.random.split(key)
    # Non-zero-mean inputs to exercise the shifted-variance statistics path.
    inputs = jax.random.normal(k_x, (N, P, C_in), dtype=jnp.float32) * 2.0 + 1.5
    weight = jax.random.normal(k_w, (C_in, C_half), dtype=jnp.float32) * 0.1
    gamma = jnp.full((C_half,), 1.2, dtype=jnp.float32)
    beta = jnp.full((C_half,), 0.1, dtype=jnp.float32)

    # Explicit tiles so both grids take multiple steps (pipelining exercised):
    #   pass 1: grid (2 splits, 2 steps); pass 2: 256 voxels / 64 = 4 steps.
    # f32 run: tight correctness check against the f32 reference.
    out32 = pfn_layer_forward(inputs, weight, gamma, beta,
                              compute_dtype=jnp.float32, out_dtype=jnp.float32,
                              tile_n=64, tile_rows=1024)
    out32 = jax.block_until_ready(out32)
    ref32 = pfn_layer_reference(inputs, weight, gamma, beta)
    assert out32.shape == (N, P, 2 * C_half), out32.shape
    err32 = float(jnp.max(jnp.abs(out32 - ref32)))
    assert err32 < 1e-2, err32

    # Default bf16-I/O run (the performance configuration); sanity check against
    # a reference computed on the same bf16-rounded inputs / weights.
    out_bf = pfn_layer_forward(inputs, weight, gamma, beta,
                               tile_n=64, tile_rows=1024)
    out_bf = jax.block_until_ready(out_bf)
    assert out_bf.dtype == jnp.bfloat16
    assert out_bf.shape == (N, P, 2 * C_half), out_bf.shape
    ref_bf = pfn_layer_reference(inputs.astype(jnp.bfloat16).astype(jnp.float32),
                                 weight.astype(jnp.bfloat16).astype(jnp.float32),
                                 gamma, beta)
    err_bf = float(jnp.max(jnp.abs(out_bf.astype(jnp.float32) - ref_bf)))
    assert err_bf < 1e-1, err_bf

    print("KERNEL_OK")
</pallas_src>

<mosaic_0001>
module attributes {stable_mosaic.version = 11 : i64} {
  func.func @_pfn_stats_kernel(%arg0: i32, %arg1: i32, %arg2: memref<128x128xf32, #tpu.memory_space<vmem>>, %arg3: memref<128x256xf32, #tpu.memory_space<vmem>>, %arg4: memref<1x256xf32, #tpu.memory_space<vmem>>, %arg5: memref<1x1x256xf32, #tpu.memory_space<vmem>>, %arg6: memref<1x1x256xf32, #tpu.memory_space<vmem>>) attributes {dimension_semantics = [#tpu.dimension_semantics<parallel>, #tpu.dimension_semantics<arbitrary>], iteration_bounds = array<i64: 2, 2>, scalar_prefetch = 0 : i64, scratch_operands = 0 : i64, tpu.core_type = #tpu.core_type<tc>, window_params = [{transform_indices = @transform_0, window_bounds = array<i64: 128, 128>}, {pipeline_mode = #tpu.pipeline_mode<synchronous>, transform_indices = @transform_1, window_bounds = array<i64: 128, 256>}, {pipeline_mode = #tpu.pipeline_mode<synchronous>, transform_indices = @transform_2, window_bounds = array<i64: 1, 256>}, {transform_indices = @transform_3, window_bounds = array<i64: 1, 1, 256>}, {transform_indices = @transform_4, window_bounds = array<i64: 1, 1, 256>}]} {
    %c0_i32 = arith.constant 0 : i32
    %0 = arith.cmpi eq, %arg1, %c0_i32 : i32
    %1 = arith.extui %0 : i1 to i32
    %c0_i32_0 = arith.constant 0 : i32
    %2 = arith.cmpi ne, %1, %c0_i32_0 : i32
    scf.if %2 {
      %cst_20 = arith.constant 0.000000e+00 : f32
      %22 = vector.broadcast %cst_20 : f32 to vector<1x1x256xf32>
      %c0_21 = arith.constant 0 : index
      %c0_22 = arith.constant 0 : index
      %c0_23 = arith.constant 0 : index
      %23 = vector.load %arg5[%c0_21, %c0_22, %c0_23] : memref<1x1x256xf32, #tpu.memory_space<vmem>>, vector<1x1x256xf32>
      tpu.vector_store %arg5[%c0_21, %c0_22, %c0_23], %22 {strides = array<i32>} : memref<1x1x256xf32, #tpu.memory_space<vmem>>, vector<1x1x256xf32>,
      %cst_24 = arith.constant 0.000000e+00 : f32
      %24 = vector.broadcast %cst_24 : f32 to vector<1x1x256xf32>
      %c0_25 = arith.constant 0 : index
      %c0_26 = arith.constant 0 : index
      %c0_27 = arith.constant 0 : index
      %25 = vector.load %arg6[%c0_25, %c0_26, %c0_27] : memref<1x1x256xf32, #tpu.memory_space<vmem>>, vector<1x1x256xf32>
      tpu.vector_store %arg6[%c0_25, %c0_26, %c0_27], %24 {strides = array<i32>} : memref<1x1x256xf32, #tpu.memory_space<vmem>>, vector<1x1x256xf32>,
    } else {
    }
    %c0 = arith.constant 0 : index
    %c0_1 = arith.constant 0 : index
    %3 = vector.load %arg2[%c0, %c0_1] : memref<128x128xf32, #tpu.memory_space<vmem>>, vector<128x128xf32>
    %c0_2 = arith.constant 0 : index
    %c0_3 = arith.constant 0 : index
    %4 = vector.load %arg3[%c0_2, %c0_3] : memref<128x256xf32, #tpu.memory_space<vmem>>, vector<128x256xf32>
    %cst = arith.constant dense<0.000000e+00> : vector<128x256xf32>
    %5 = tpu.matmul %3, %4, %cst {dimension_numbers = #tpu.dot_dimension_numbers<[1], [0], [0], [1], [0, 0, 1, 1], [], []>} : vector<128x128xf32>, vector<128x256xf32>, vector<128x256xf32> -> vector<128x256xf32>
    %c0_4 = arith.constant 0 : index
    %c0_5 = arith.constant 0 : index
    %6 = vector.load %arg4[%c0_4, %c0_5] : memref<1x256xf32, #tpu.memory_space<vmem>>, vector<1x256xf32>
    %7 = vector.broadcast %6 : vector<1x256xf32> to vector<128x256xf32>
    %8 = arith.subf %5, %7 : vector<128x256xf32>
    %c0_6 = arith.constant 0 : index
    %c0_7 = arith.constant 0 : index
    %c0_8 = arith.constant 0 : index
    %9 = vector.load %arg5[%c0_6, %c0_7, %c0_8] : memref<1x1x256xf32, #tpu.memory_space<vmem>>, vector<1x1x256xf32>
    %cst_9 = arith.constant dense<0.000000e+00> : vector<256xf32>
    %10 = vector.multi_reduction <add>, %8, %cst_9 [0] : vector<128x256xf32> to vector<256xf32>
    %11 = vector.shape_cast %10 : vector<256xf32> to vector<1x256xf32>
    %12 = vector.shape_cast %11 : vector<1x256xf32> to vector<1x1x256xf32>
    %13 = arith.addf %9, %12 : vector<1x1x256xf32>
    %c0_10 = arith.constant 0 : index
    %c0_11 = arith.constant 0 : index
    %c0_12 = arith.constant 0 : index
    %14 = vector.load %arg5[%c0_10, %c0_11, %c0_12] : memref<1x1x256xf32, #tpu.memory_space<vmem>>, vector<1x1x256xf32>
    tpu.vector_store %arg5[%c0_10, %c0_11, %c0_12], %13 {strides = array<i32>} : memref<1x1x256xf32, #tpu.memory_space<vmem>>, vector<1x1x256xf32>,
    %c0_13 = arith.constant 0 : index
    %c0_14 = arith.constant 0 : index
    %c0_15 = arith.constant 0 : index
    %15 = vector.load %arg6[%c0_13, %c0_14, %c0_15] : memref<1x1x256xf32, #tpu.memory_space<vmem>>, vector<1x1x256xf32>
    %16 = arith.mulf %8, %8 : vector<128x256xf32>
    %cst_16 = arith.constant dense<0.000000e+00> : vector<256xf32>
    %17 = vector.multi_reduction <add>, %16, %cst_16 [0] : vector<128x256xf32> to vector<256xf32>
    %18 = vector.shape_cast %17 : vector<256xf32> to vector<1x256xf32>
    %19 = vector.shape_cast %18 : vector<1x256xf32> to vector<1x1x256xf32>
    %20 = arith.addf %15, %19 : vector<1x1x256xf32>
    %c0_17 = arith.constant 0 : index
    %c0_18 = arith.constant 0 : index
    %c0_19 = arith.constant 0 : index
    %21 = vector.load %arg6[%c0_17, %c0_18, %c0_19] : memref<1x1x256xf32, #tpu.memory_space<vmem>>, vector<1x1x256xf32>
    tpu.vector_store %arg6[%c0_17, %c0_18, %c0_19], %20 {strides = array<i32>} : memref<1x1x256xf32, #tpu.memory_space<vmem>>, vector<1x1x256xf32>,
    return
  }
  func.func @transform_0(%arg0: i32, %arg1: i32) -> (i32, i32) {
    %c2_i32 = arith.constant 2 : i32
    %0 = arith.muli %arg0, %c2_i32 : i32
    %1 = arith.addi %0, %arg1 : i32
    %c0_i32 = arith.constant 0 : i32
    %c0_i32_0 = arith.constant 0 : i32
    return %1, %c0_i32 : i32, i32
  }
  func.func @transform_1(%arg0: i32, %arg1: i32) -> (i32, i32) {
    %c0_i32 = arith.constant 0 : i32
    %c0_i32_0 = arith.constant 0 : i32
    %c0_i32_1 = arith.constant 0 : i32
    return %c0_i32, %c0_i32_0 : i32, i32
  }
  func.func @transform_2(%arg0: i32, %arg1: i32) -> (i32, i32) {
    %c0_i32 = arith.constant 0 : i32
    %c0_i32_0 = arith.constant 0 : i32
    %c0_i32_1 = arith.constant 0 : i32
    return %c0_i32, %c0_i32_0 : i32, i32
  }
  func.func @transform_3(%arg0: i32, %arg1: i32) -> (i32, i32, i32) {
    %c0_i32 = arith.constant 0 : i32
    %c0_i32_0 = arith.constant 0 : i32
    %c0_i32_1 = arith.constant 0 : i32
    return %arg0, %c0_i32, %c0_i32_0 : i32, i32, i32
  }
  func.func @transform_4(%arg0: i32, %arg1: i32) -> (i32, i32, i32) {
    %c0_i32 = arith.constant 0 : i32
    %c0_i32_0 = arith.constant 0 : i32
    %c0_i32_1 = arith.constant 0 : i32
    return %arg0, %c0_i32, %c0_i32_0 : i32, i32, i32
  }
}

</mosaic_0001>

<bundles_post_ra>
// kernel: tpu_custom_call.1
= control target key start
LH: loop header
LB: loop body
LE: loop exit
PB: predicated region body
PF: predicated region fallthrough
CT: control target
= control target key end

     0   :  { %s1656_s0 = inlined_call_operand.hbm [shape: f32[512,128], index: 0, kind: input, shape index: {}]   ;;  %s1657_s1 = inlined_call_operand.hbm [shape: f32[128,256], index: 1, kind: input, shape index: {}]   ;;  %s1658_s2 = inlined_call_operand.vmem [shape: f32[1,256], index: 2, kind: input, shape index: {}]   ;;  %s1659_s3 = inlined_call_operand.hbm [shape: f32[2,1,256], index: 3, kind: output, shape index: {0}]   ;;  %s1660_s4 = inlined_call_operand.hbm [shape: f32[2,1,256], index: 4, kind: output, shape index: {1}]  }
   0x1   :  { %1669 = sst [smem:[#allocation19_spill]] %s1657_s1 }
   0x2   :  { %1670 = sst [smem:[#allocation20_spill]] %s1658_s2 }
   0x3   :  { %1671 = sst [smem:[#allocation21_spill]] %s1659_s3 }
   0x4   :  { %1672 = sst [smem:[#allocation22_spill]] %s1660_s4 }
   0x5   :  { %10 = vsyncpa [#allocation3], 0 }
   0x6   :  { %12 = vsyncpa [#allocation3 + $0x1], 0 }
   0x7   :  { %13 = vsyncpa [#allocation6], 0 }
   0x8   :  { %14 = vsyncpa [#allocation4], 0 }
   0x9   :  { %16 = vsyncpa [#allocation4 + $0x1], 0 }
   0xa   :  { %17 = vsyncpa [#allocation9], 0 }
   0xb   :  { %19 = vsyncpa [#allocation9 + $0x1], 0  ;;  %s1278_s15 = smov 0   ;;  %s1280_s16 = smov 0  }
   0xc   :  { %s1282_s17 = smov 0   ;;  %s1284_s18 = smov 0  }
   0xd   :  { %s1286_s19 = smov 0   ;;  %s1288_s20 = smov 0  }
   0xe   :  { %s1290_s21 = smov 0   ;;  %s1292_s22 = smov 0  }
   0xf   :  { %s1294_s23 = smov 0   ;;  %s1296_s24 = smov 0  }
  0x10   :  { %s1298_s25 = smov 0  }
  0x11 LB: > { %1673 = sst [smem:[#allocation14_spill]] %s1200_s15  ;;  %s847_s26 = sadd.s32 4294967295, %s1240_s25   ;;  %s1240_s25 = sphi %s1298_s25, %s25_s25   ;;  %s1236_s24 = sphi %s1296_s24, %s1709_s24   ;;  %s1232_s23 = sphi %s1294_s23, %s1708_s23   ;;  %s1228_s22 = sphi %s1292_s22, %s1707_s22   ;;  %s1224_s21 = sphi %s1290_s21, %s1699_s21   ;;  %s1220_s20 = sphi %s1288_s20, %s1706_s20   ;;  %s1216_s19 = sphi %s1286_s19, %s1705_s19   ;;  %s1212_s18 = sphi %s1284_s18, %s1704_s18   ;;  %s1208_s17 = sphi %s1282_s17, %s1703_s17   ;;  %s1204_s16 = sphi %s1280_s16, %s1702_s16   ;;  %s1200_s15 = sphi %s1278_s15, %s1701_s15  }
  0x12   : > { %1674 = sst [smem:[#allocation15_spill]] %s1228_s22  ;;  %s848_s27 = sadd.s32 4294967294, %s1240_s25  }
  0x13   : > { %1675 = sst [smem:[#allocation16_spill]] %s1232_s23  ;;  %p61_p0 = scmp.ne.s32.totalorder %s1216_s19, %s1212_s18 }
  0x14   : > { %p1334_p1 = scmp.eq.s32.totalorder %s847_s26, 0  ;;  %p126_p2 = scmp.ne.s32.totalorder %s1208_s17, %s1204_s16 }
  0x15   : > { %p127_p4 = scmp.eq.s32.totalorder %s847_s26, 3  ;;  %p132_p5 = scmp.ne.s32.totalorder %s1204_s16, %s1200_s15 }
  0x16   : > { %p1343_p3 = por %p1334_p1, %p61_p0  ;;  %p133_p6 = scmp.eq.s32.totalorder %s848_s27, 3 }
  0x17   : > { %p1349_p7 = por %p127_p4, %p126_p2  ;;  %p851_p8 = scmp.ge.s32.totalorder %s1240_s25, 1 }
  0x18   : > { %p1354_p9 = por %p133_p6, %p132_p5  ;;  %p166_p10 = scmp.lt.s32.totalorder %s1240_s25, 5 }
  0x19   : > { %s1678_s5 = scalar_select %p1349_p7, 1, 0 }
  0x1a   : > { %s1680_s6 = scalar_select %p1354_p9, 1, 0 }
  0x1b   : > { %1679 = sst [smem:[#allocation17_spill]] %s1678_s5  ;;  %p1359_p11 = pnand %p851_p8, %p166_p10 }
  0x1c   : > { %1681 = sst [smem:[#allocation18_spill]] %s1680_s6  ;;  %s1242_s8 = smov [#allocation5]  }
  0x1d   : > { %s178_s9 = sshll.u32 %s1242_s8, 4  ;;  %p917_p12 = pneg %p1359_p11  ;;  %s179_s9 = int_to_ptr.vmem [resolvable:$true] %s178_s9 }
  0x1e   : > { %s1043_s10 = scalar_lea.vmem %s179_s9, 4096  ;;  %p1051_p6 = scmp.lt.s32.totalorder %s179_s9, %s179_s9 }
  0x1f   : > { %p918_p13 = pnand %p917_p12, %p1334_p1  ;;  %p1044_p2 = scmp.ne.s32.totalorder %s179_s9, %s1043_s10 }
  0x20   : > { %p1052_p9 = scmp.lt.s32.totalorder %s1043_s10, %s1043_s10 }
  0x21   : > { %p1034_p0 = pneg %p918_p13 }
  0x22   : > { %p1053_p7 = por %p1052_p9, %p1051_p6 }
  0x23   : > { %p1046_p4 = pnand %p1044_p2, %p1034_p0 }
  0x25   : > { %p1047_p5 = pneg %p1046_p4 }
  0x27   : > { %p1054_p8 = pnand %p1053_p7, %p1047_p5 }
  0x29   : > { %1057 = shalt.err (!%p1054_p8)
}
  0x2a   : > { %s1243_s11 = smov 256   ;;  %s1244_s12 = smov 16  }
  0x2b   : > { %s1683_s1 = sld [smem:[#allocation19_spill]]  ;;  %s34_s18 = sadd.s32 1, %s1232_s23 }
  0x2c   : > { %p35_p7 = scmp.ge.s32.totalorder %s34_s18, 2  ;;  %s37_s26 = sadd.s32 1, %s1236_s24 }
  0x2d   : > { %s849_s27 = sshll.u32 %s1236_s24, 1  ;;  %s48_s8 = sadd.s32 1, %s1220_s20 }
  0x2e   : > { %s1711_s18 = smov (%p35_p7, %s34_s18), 0  ;;  %s1713_s26 = smov (!%p35_p7, %s37_s26), %s1236_s24 }
  0x2f   : > { %s42_s10 = sadd.s32 %s1232_s23, %s849_s27  ;;  %p55_p9 = scmp.ne.s32.totalorder %s1220_s20, %s1216_s19 }
  0x30   : > { %p39_p10 = scmp.ge.s32.totalorder %s1713_s26, 2  ;;  %p56_p12 = scmp.eq.s32.totalorder %s1240_s25, 0 }
  0x31   : > { %920 = dma.hbm_to_vmem [thread:$0]  (!%p918_p13), %s1683_s1, 4096, %s179_s9, [#allocation6], %s1243_s11, %s1243_s11, %s1244_s12  }
  0x32   : > { %p933_p0 = scmp.lt.s32.totalorder %s1240_s25, 4  ;;  %s195_s13 = sand.u32 1, %s1220_s20  }
  0x33   : > { %s1715_s26 = smov (%p39_p10, %s1713_s26), 0  ;;  %p1385_p13 = por %p56_p12, %p55_p9 }
  0x34   : > { %s850_s11 = sshll.u32 %s1715_s26, 1  ;;  %s113_s12 = ssub.s32 %s1236_s24, %s1715_s26 }
  0x35   : > { %s44_s14 = sadd.s32 %s850_s11, %s1711_s18  ;;  %p114_p2 = scmp.eq.s32.totalorder %s113_s12, 0 }
  0x36   : > { %s45_s27 = ssub.s32 %s42_s10, %s44_s14  ;;  %s854_s29 = sshll.u32 %s195_s13, 7 }
  0x37   : > { %p46_p4 = scmp.eq.s32.totalorder %s45_s27, 0  ;;  %s1685_s1 = sadd.s32 1, %s1208_s17 }
  0x38   : > { %s1396_s23 = scalar_select %p114_p2, %s1208_s17, %s1685_s1  }
  0x39   : > { %s1399_s6 = scalar_select %p46_p4, %s1220_s20, %s48_s8  }
  0x3a   : > { %s872_s15 = sshll.u32 %s42_s10, 11  ;;  %s199_s4 = scalar_lea.vmem [#allocation2], %s854_s29 }
  0x3b   : > { %s208_s3 = sshll.u32 %s199_s4, 4  ;;  %s207_s2 = scalar_lea.hbm %s1656_s0, %s872_s15  ;;  %s209_s3 = int_to_ptr.vmem [resolvable:$true] %s208_s3 }
  0x3c   : > { %p1408_p5 = pnand %p933_p0, %p1385_p13  ;;  %s196_s12 = scalar_lea.sflag [#allocation3], %s195_s13 }
  0x3d   : > { %s1071_s1 = scalar_lea.vmem %s209_s3, 2048  ;;  %s1245_s4 = smov [#allocation2]  }
  0x3e   : > { %p1060_p6 = pneg %p1408_p5  ;;  %p1072_p8 = scmp.ne.s32.totalorder %s209_s3, %s1071_s1 }
  0x3f   : > { %s1076_s29 = sshll.u32 %s1245_s4, 4  ;;  %s1077_s29 = int_to_ptr.vmem [resolvable:$false] %s1076_s29 }
  0x40   : > { %p1074_p7 = pnand %p1072_p8, %p1060_p6  ;;  %s1078_s22 = scalar_lea.vmem %s1077_s29, 4096 }
  0x41   : > { %p1079_p10 = scmp.lt.s32.totalorder %s209_s3, %s1077_s29  ;;  %p1080_p12 = scmp.lt.s32.totalorder %s1078_s22, %s1071_s1 }
  0x42   : > { %p1075_p9 = pneg %p1074_p7 }
  0x43   : > { %p1081_p2 = por %p1080_p12, %p1079_p10 }
  0x45   : > { %p1082_p4 = pnand %p1081_p2, %p1075_p9 }
  0x47   : > { %1085 = shalt.err (!%p1082_p4)
}
  0x48   : > { %s1246_s15 = smov 128   ;;  %s1247_s5 = smov 8  }
  0x49   : > { %924 = dma.hbm_to_vmem [thread:$0]  (!%p1408_p5), %s207_s2, 2048, %s209_s3, %s196_s12, %s1246_s15, %s1246_s15, %s1247_s5  }
  0x4a   : > { %220 = sbr.rel (%p1359_p11) target bundleno = 425 (0x1a9), region = 32  ;;  %s222_s8 = sand.u32 (!%p1359_p11), 1, %s1216_s19  }
  0x4b   : > { %s859_s10 = sshll.u32 (!%p1359_p11), %s222_s8, 7  ;;  %s223_s13 = scalar_lea.sflag (!%p1359_p11), [#allocation3], %s222_s8 }
  0x4c   : > { %s1419_s9 = scalar_lea.vmem (!%p1359_p11), [#allocation2], %s859_s10 }
  0x4f   : > { %1183 = dma.done.wait (%p1343_p3), %s223_s13, 2048  }
  0x50   : > { %1185 = vsyncadd (%p1343_p3), %s223_s13, 4294965248 }
  0x51   : > { %1187 = dma.done.wait (%p1334_p1), [#allocation6], 4096  }
  0x52   : > { %1189 = vsyncadd (%p1334_p1), [#allocation6], 4294963200  ;;  %s1430_s2 = sand.u32 1, %s1204_s16   ;;  %p863_p11 = scmp.ne.s32.totalorder %s1224_s21, 0 }
  0x53   : > { %s861_s3 = sshll.u32 %s1430_s2, 1 }
  0x54   : > { %s1433_s7 = scalar_lea.vmem [#allocation7], %s861_s3  ;;  %s1435_s14 = scalar_lea.vmem [#allocation8], %s861_s3 }
  0x55   : > { %266 = sbr.rel (%p863_p11) target bundleno = 94 (0x5e), region = 44 }
  0x5a   : > { %v267_v0 = vlaneseq  ;;  %v1248_v1 = vmov 0.0  }
  0x5c   : > { %vm269_vm0 = vcmp.lt.s32.totalorder %v267_v0, 256 }
  0x5d   : > { %271 = vst.msk [vmem:[%s1433_s7] sm:$0x3] %vm269_vm0, %v1248_v1  ;;  %272 = vst.msk [vmem:[%s1435_s14] sm:$0x3] %vm269_vm0, %v1248_v1 }
  0x5e PF: > { %v320_v2 = vld [vmem:[#allocation5 + $0xf8] sm:$0xff]  ;;  %v319_v3 = vld [vmem:[#allocation5 + $0xf0] sm:$0xff]  ;;  %v318_v4 = vld [vmem:[#allocation5 + $0xe8] sm:$0xff]  ;;  %v1249_v24 = vmov 0.0   ;;  %v484_v51 = vlaneseq  ;;  %s1687_s30 = sld [smem:[#allocation20_spill]]  ;;  %s708_s12 = sshll.u32 %s1433_s7, 4  ;;  %s1562_s12 = int_to_ptr.vmem [resolvable:$true] %s708_s12 }
  0x5f   : > { %321 = vmatprep.subr.mxu0 %v320_v2  ;;  %v317_v5 = vld [vmem:[#allocation5 + $0xe0] sm:$0xff]  ;;  %875 = vmatprep.subr.mxu1 %v320_v2  ;;  %v316_v6 = vld [vmem:[#allocation5 + $0xd8] sm:$0xff]  ;;  %v315_v7 = vld [vmem:[#allocation5 + $0xd0] sm:$0xff]  ;;  %s1688_s27 = sld [smem:[#allocation15_spill]]  ;;  %s722_s4 = sshll.u32 %s1435_s14, 4  ;;  %s1572_s4 = int_to_ptr.vmem [resolvable:$true] %s722_s4 }
  0x60   : > { %322 = vmatpush1.msra.mxu0 %v319_v3  ;;  %891 = vmatpush1.msra.mxu1 %v319_v3  ;;  %v314_v8 = vld [vmem:[#allocation5 + $0xc8] sm:$0xff]  ;;  %v313_v9 = vld [vmem:[#allocation5 + $0xc0] sm:$0xff]  ;;  %v312_v10 = vld [vmem:[#allocation5 + $0xb8] sm:$0xff]  ;;  %v1473_v53 = vshrl.u32 %v484_v51, 7  ;;  %s1689_s1 = sld [smem:[#allocation17_spill]]  ;;  %vm1551_vm1 = vcmp.lt.s32.totalorder %v484_v51, 256 }
  0x61   : > { %323 = vmatprep.subr.mxu0 %v318_v4  ;;  %876 = vmatprep.subr.mxu1 %v318_v4  ;;  %v311_v11 = vld [vmem:[#allocation5 + $0xb0] sm:$0xff]  ;;  %v310_v12 = vld [vmem:[#allocation5 + $0xa8] sm:$0xff]  ;;  %v309_v13 = vld [vmem:[#allocation5 + $0xa0] sm:$0xff]  ;;  %s1692_s15 = sld [smem:[#allocation21_spill]]  ;;  %s689_s21 = scalar_lea.sflag [#allocation4], %s1430_s2 }
  0x62   : > { %324 = vmatpush1.msra.mxu0 %v317_v5  ;;  %892 = vmatpush1.msra.mxu1 %v317_v5  ;;  %v308_v14 = vld [vmem:[#allocation5 + $0x98] sm:$0xff]  ;;  %v307_v15 = vld [vmem:[#allocation5 + $0x90] sm:$0xff]  ;;  %v306_v16 = vld [vmem:[#allocation5 + $0x88] sm:$0xff]  ;;  %v486_v58 = vsub.s32 0, %v1473_v53  ;;  %v490_v62 = vsub.s32 1, %v1473_v53  ;;  %s1086_s28 = scalar_lea.vmem %s1562_s12, 32 }
  0x63   : > { %325 = vmatprep.subr.mxu0 %v316_v6  ;;  %877 = vmatprep.subr.mxu1 %v316_v6  ;;  %v305_v17 = vld [vmem:[#allocation5 + $0x80] sm:$0xff]  ;;  %v304_v18 = vld [vmem:[#allocation5 + $0x78] sm:$0xff]  ;;  %v303_v19 = vld [vmem:[#allocation5 + $0x70] sm:$0xff]  ;;  %p1087_p1 = scmp.ne.s32.totalorder %s1562_s12, %s1086_s28 }
  0x64   : > { %326 = vmatpush1.msra.mxu0 %v315_v7  ;;  %893 = vmatpush1.msra.mxu1 %v315_v7  ;;  %v302_v20 = vld [vmem:[#allocation5 + $0x68] sm:$0xff]  ;;  %v301_v21 = vld [vmem:[#allocation5 + $0x60] sm:$0xff]  ;;  %v300_v22 = vld [vmem:[#allocation5 + $0x58] sm:$0xff] }
  0x65   : > { %327 = vmatprep.subr.mxu0 %v314_v8  ;;  %878 = vmatprep.subr.mxu1 %v314_v8  ;;  %v299_v23 = vld [vmem:[#allocation5 + $0x50] sm:$0xff]  ;;  %v298_v25 = vld [vmem:[#allocation5 + $0x48] sm:$0xff]  ;;  %v297_v26 = vld [vmem:[#allocation5 + $0x40] sm:$0xff]  ;;  %s873_s11 = sshll.u32 %s1688_s27, 5 }
  0x66   : > { %328 = vmatpush1.msra.mxu0 %v313_v9  ;;  %894 = vmatpush1.msra.mxu1 %v313_v9  ;;  %v296_v27 = vld [vmem:[#allocation5 + $0x38] sm:$0xff]  ;;  %v295_v28 = vld [vmem:[#allocation5 + $0x30] sm:$0xff]  ;;  %v294_v29 = vld [vmem:[#allocation5 + $0x28] sm:$0xff]  ;;  %p1695_p3 = scmp.ne.s32.totalorder %s1689_s1, 0 }
  0x67   : > { %329 = vmatprep.subr.mxu0 %v312_v10  ;;  %879 = vmatprep.subr.mxu1 %v312_v10  ;;  %v293_v30 = vld [vmem:[#allocation5 + $0x20] sm:$0xff]  ;;  %v292_v31 = vld [vmem:[#allocation5 + $0x18] sm:$0xff]  ;;  %v291_v32 = vld [vmem:[#allocation5 + $0x10] sm:$0xff]  ;;  %s1693_s5 = smov %s1692_s15  ;;  %s1560_s8 = scalar_lea.hbm %s1692_s15, %s873_s11 }
  0x68   : > { %330 = vmatpush1.msra.mxu0 %v311_v11  ;;  %895 = vmatpush1.msra.mxu1 %v311_v11  ;;  %v290_v33 = vld [vmem:[#allocation5 + $0x8] sm:$0xff]  ;;  %v289_v34 = vld [vmem:[#allocation5] sm:$0xff]  ;;  %v275_v39 = vld [vmem:[%s1419_s9 + $0x10] sm:$0xff]  ;;  %p1088_p0 = pnand %p1087_p1, %p1695_p3 }
  0x69   : > { %331 = vmatprep.subr.mxu0 %v310_v12  ;;  %880 = vmatprep.subr.mxu1 %v310_v12  ;;  %v273_v35 = vld [vmem:[%s1419_s9] sm:$0xff]  ;;  %v274_v37 = vld [vmem:[%s1419_s9 + $0x8] sm:$0xff]  ;;  %v283_v40 = vld [vmem:[%s1419_s9 + $0x50] sm:$0xff] }
  0x6a   : > { %332 = vmatpush1.msra.mxu0 %v309_v13  ;;  %896 = vmatpush1.msra.mxu1 %v309_v13  ;;  %v281_v36 = vld [vmem:[%s1419_s9 + $0x40] sm:$0xff]  ;;  %v282_v38 = vld [vmem:[%s1419_s9 + $0x48] sm:$0xff]  ;;  %v276_v41 = vld [vmem:[%s1419_s9 + $0x18] sm:$0xff]  ;;  %p1089_p13 = pneg %p1088_p0 }
  0x6b   : > { %333 = vmatprep.subr.mxu0 %v308_v14  ;;  %881 = vmatprep.subr.mxu1 %v308_v14  ;;  %v284_v42 = vld [vmem:[%s1419_s9 + $0x58] sm:$0xff]  ;;  %v277_v43 = vld [vmem:[%s1419_s9 + $0x20] sm:$0xff]  ;;  %v278_v45 = vld [vmem:[%s1419_s9 + $0x28] sm:$0xff] }
  0x6c   : > { %334 = vmatpush1.msra.mxu0 %v307_v15  ;;  %897 = vmatpush1.msra.mxu1 %v307_v15  ;;  %v285_v44 = vld [vmem:[%s1419_s9 + $0x60] sm:$0xff]  ;;  %v286_v46 = vld [vmem:[%s1419_s9 + $0x68] sm:$0xff]  ;;  %v279_v47 = vld [vmem:[%s1419_s9 + $0x30] sm:$0xff] }
  0x6d   : > { %335 = vmatprep.subr.mxu0 %v306_v16  ;;  %882 = vmatprep.subr.mxu1 %v306_v16  ;;  %v287_v48 = vld [vmem:[%s1419_s9 + $0x70] sm:$0xff]  ;;  %v280_v49 = vld [vmem:[%s1419_s9 + $0x38] sm:$0xff]  ;;  %v482_v59 = vld [vmem:[%s1687_s30] sm:$0x3]  ;;  %s1251_s30 = smov [#allocation7]  }
  0x6e   : > { %336 = vmatpush1.msra.mxu0 %v305_v17  ;;  %898 = vmatpush1.msra.mxu1 %v305_v17  ;;  %v288_v50 = vld [vmem:[%s1419_s9 + $0x78] sm:$0xff]  ;;  %v1486_v1 = vrot.slane %v482_v59, %v486_v58  ;;  %v1490_v4 = vrot.slane %v482_v59, %v490_v62  ;;  %s1694_s9 = sld [smem:[#allocation22_spill]]  ;;  %s1090_s27 = sshll.u32 %s1251_s30, 4  ;;  %s1091_s27 = int_to_ptr.vmem [resolvable:$false] %s1090_s27 }
  0x6f   : > { %337 = vmatprep.subr.mxu0 %v304_v18  ;;  %883 = vmatprep.subr.mxu1 %v304_v18  ;;  %s1092_s29 = scalar_lea.vmem %s1091_s27, 64  ;;  %p1093_p5 = scmp.lt.s32.totalorder %s1562_s12, %s1091_s27 }
  0x70   : > { %338 = vmatpush1.msra.mxu0 %v303_v19  ;;  %899 = vmatpush1.msra.mxu1 %v303_v19  ;;  %p1094_p6 = scmp.lt.s32.totalorder %s1092_s29, %s1086_s28 }
  0x71   : > { %339 = vmatprep.subr.mxu0 %v302_v20  ;;  %385 = vmatprep.mubr.f32.mxu0 %v1249_v24 }
  0x72   : > { %340 = vmatpush1.msra.mxu0 %v301_v21  ;;  %884 = vmatprep.subr.mxu1 %v302_v20  ;;  %p1095_p8 = por %p1094_p6, %p1093_p5 }
  0x73   : > { %341 = vmatprep.subr.mxu0 %v300_v22  ;;  %900 = vmatpush1.msra.mxu1 %v301_v21 }
  0x74   : > { %342 = vmatpush1.msra.mxu0 %v299_v23  ;;  %885 = vmatprep.subr.mxu1 %v300_v22  ;;  %s1570_s3 = scalar_lea.hbm %s1694_s9, %s873_s11  ;;  %p1096_p7 = pnand %p1095_p8, %p1089_p13 }
  0x75   : > { %343 = vmatprep.subr.mxu0 %v298_v25  ;;  %901 = vmatpush1.msra.mxu1 %v299_v23 }
  0x76   : > { %344 = vmatpush1.msra.mxu0 %v297_v26  ;;  %886 = vmatprep.subr.mxu1 %v298_v25 }
  0x77   : > { %345 = vmatprep.subr.mxu0 %v296_v27  ;;  %902 = vmatpush1.msra.mxu1 %v297_v26 }
  0x78   : > { %346 = vmatpush1.msra.mxu0 %v295_v28  ;;  %887 = vmatprep.subr.mxu1 %v296_v27 }
  0x79   : > { %347 = vmatprep.subr.mxu0 %v294_v29  ;;  %903 = vmatpush1.msra.mxu1 %v295_v28 }
  0x7a   : > { %348 = vmatpush1.msra.mxu0 %v293_v30  ;;  %888 = vmatprep.subr.mxu1 %v294_v29 }
  0x7b   : > { %349 = vmatprep.subr.mxu0 %v292_v31  ;;  %904 = vmatpush1.msra.mxu1 %v293_v30 }
  0x7c   : > { %350 = vmatpush1.msra.mxu0 %v291_v32  ;;  %889 = vmatprep.subr.mxu1 %v292_v31 }
  0x7d   : > { %351 = vmatprep.subr.mxu0 %v290_v33  ;;  %905 = vmatpush1.msra.mxu1 %v291_v32 }
  0x7e   : > { %352 = vmatpush1.msra.mxu0 %v289_v34  ;;  %890 = vmatprep.subr.mxu1 %v290_v33 }
  0x7f   : > { %386 = vmatmul.mubr.f32.vlgmr.msra.gmra.mxu0 %v273_v35  ;;  %906 = vmatpush1.msra.mxu1 %v289_v34 }
  0x80   : > { %391 = vmatprep.mubr.f32.mxu0 %v1249_v24  ;;  %433 = vmatprep.mubr.f32.mxu1 %v1249_v24 }
  0x81   : > { %434 = vmatmul.mubr.f32.vlgmr.msra.gmra.mxu1 %v281_v36 }
  0x82   : > { %439 = vmatprep.mubr.f32.mxu1 %v1249_v24 }
  0x83   : > { %392 = vmatmul.mubr.f32.gmra.mxu0 %v274_v37 }
  0x84   : > { %397 = vmatprep.mubr.f32.mxu0 %v1249_v24 }
  0x85   : > { %440 = vmatmul.mubr.f32.gmra.mxu1 %v282_v38 }
  0x86   : > { %445 = vmatprep.mubr.f32.mxu1 %v1249_v24 }
  0x87   : > { %398 = vmatmul.mubr.f32.gmra.mxu0 %v275_v39 }
  0x88   : > { %403 = vmatprep.mubr.f32.mxu0 %v1249_v24 }
  0x89   : > { %446 = vmatmul.mubr.f32.gmra.mxu1 %v283_v40 }
  0x8a   : > { %451 = vmatprep.mubr.f32.mxu1 %v1249_v24 }
  0x8b   : > { %404 = vmatmul.mubr.f32.gmra.mxu0 %v276_v41 }
  0x8c   : > { %409 = vmatprep.mubr.f32.mxu0 %v1249_v24 }
  0x8d   : > { %452 = vmatmul.mubr.f32.gmra.mxu1 %v284_v42 }
  0x8e   : > { %457 = vmatprep.mubr.f32.mxu1 %v1249_v24 }
  0x8f   : > { %410 = vmatmul.mubr.f32.gmra.mxu0 %v277_v43 }
  0x90   : > { %415 = vmatprep.mubr.f32.mxu0 %v1249_v24 }
  0x91   : > { %458 = vmatmul.mubr.f32.gmra.mxu1 %v285_v44 }
  0x92   : > { %463 = vmatprep.mubr.f32.mxu1 %v1249_v24 }
  0x93   : > { %416 = vmatmul.mubr.f32.gmra.mxu0 %v278_v45 }
  0x94   : > { %421 = vmatprep.mubr.f32.mxu0 %v1249_v24 }
  0x95   : > { %464 = vmatmul.mubr.f32.gmra.mxu1 %v286_v46 }
  0x96   : > { %469 = vmatprep.mubr.f32.mxu1 %v1249_v24 }
  0x97   : > { %422 = vmatmul.mubr.f32.gmra.mxu0 %v279_v47 }
  0x98   : > { %427 = vmatprep.mubr.f32.mxu0 %v1249_v24 }
  0x99   : > { %470 = vmatmul.mubr.f32.gmra.mxu1 %v287_v48 }
  0x9a   : > { %475 = vmatprep.mubr.f32.mxu1 %v1249_v24 }
  0x9b   : > { %428 = vmatmul.mubr.f32.gmra.mxu0 %v280_v49 }
  0x9d   : > { %476 = vmatmul.mubr.f32.gmra.mxu1 %v288_v50 }
 0x13f   : > { %v387_v52 = vpop.f32.mrf.mxu0 }
 0x140   : > { %v494_v8 = vsub.f32 %v387_v52, %v1486_v1 }
 0x141   : > { %v389_v54 = vpop.f32.mrf.mxu0  ;;  %v435_v55 = vpop.f32.mrf.mxu1 }
 0x142   : > { %v495_v13 = vsub.f32 %v389_v54, %v1490_v4  ;;  %v594_v19 = vmul.f32 %v494_v8, %v494_v8  ;;  %v510_v45 = vsub.f32 %v435_v55, %v1486_v1 }
 0x143   : > { %v393_v56 = vpop.f32.mrf.mxu0  ;;  %v1475_v57 = vpop.f32.mrf.mxu1 }
 0x144   : > { %v496_v5 = vsub.f32 %v393_v56, %v1486_v1  ;;  %v595_v26 = vmul.f32 %v495_v13, %v495_v13 }
 0x145   : > { %v395_v60 = vpop.f32.mrf.mxu0  ;;  %v1481_v61 = vpop.f32.mrf.mxu1 }
 0x146   : > { %v497_v9 = vsub.f32 %v395_v60, %v1490_v4  ;;  %v596_v14 = vmul.f32 %v496_v5, %v496_v5  ;;  %v527_v27 = vadd.f32 %v496_v5, %v494_v8 }
 0x147   : > { %v399_v63 = vpop.f32.mrf.mxu0  ;;  %v1484_v0 = vpop.f32.mrf.mxu1 }
 0x148   : > { %v498_v10 = vsub.f32 %v399_v63, %v1486_v1  ;;  %v597_v20 = vmul.f32 %v497_v9, %v497_v9  ;;  %v626_v28 = vadd.f32 %v596_v14, %v594_v19  ;;  %v548_v34 = vadd.f32 %v497_v9, %v495_v13 }
 0x149   : > { %v401_v2 = vpop.f32.mrf.mxu0  ;;  %v1488_v3 = vpop.f32.mrf.mxu1  ;;  %v610_v9 = vmul.f32 %v510_v45, %v510_v45 }
 0x14a   : > { %v499_v15 = vsub.f32 %v401_v2, %v1490_v4  ;;  %v598_v21 = vmul.f32 %v498_v10, %v498_v10  ;;  %v528_v35 = vadd.f32 %v527_v27, %v498_v10  ;;  %v647_v37 = vadd.f32 %v597_v20, %v595_v26 }
 0x14b   : > { %v405_v6 = vpop.f32.mrf.mxu0  ;;  %v1493_v7 = vpop.f32.mrf.mxu1  ;;  %v511_v20 = vsub.f32 %v1475_v57, %v1490_v4 }
 0x14c   : > { %v500_v16 = vsub.f32 %v405_v6, %v1486_v1  ;;  %v599_v29 = vmul.f32 %v499_v15, %v499_v15  ;;  %v627_v38 = vadd.f32 %v626_v28, %v598_v21  ;;  %v549_v43 = vadd.f32 %v548_v34, %v499_v15 }
 0x14d   : > { %v407_v11 = vpop.f32.mrf.mxu0  ;;  %v1498_v12 = vpop.f32.mrf.mxu1  ;;  %v512_v21 = vsub.f32 %v1481_v61, %v1486_v1  ;;  %v515_v57 = vsub.f32 %v1493_v7, %v1490_v4 }
 0x14e   : > { %v501_v22 = vsub.f32 %v407_v11, %v1490_v4  ;;  %v600_v30 = vmul.f32 %v500_v16, %v500_v16  ;;  %v529_v44 = vadd.f32 %v528_v35, %v500_v16  ;;  %v648_v47 = vadd.f32 %v647_v37, %v599_v29 }
 0x14f   : > { %v411_v17 = vpop.f32.mrf.mxu0  ;;  %v1503_v18 = vpop.f32.mrf.mxu1 }
 0x150   : > { %v502_v23 = vsub.f32 %v411_v17, %v1486_v1  ;;  %v601_v39 = vmul.f32 %v501_v22, %v501_v22  ;;  %v628_v48 = vadd.f32 %v627_v38, %v600_v30  ;;  %v550_v54 = vadd.f32 %v549_v43, %v501_v22 }
 0x151   : > { %v413_v24 = vpop.f32.mrf.mxu0  ;;  %v1507_v25 = vpop.f32.mrf.mxu1  ;;  %v513_v30 = vsub.f32 %v1484_v0, %v1490_v4  ;;  %v611_v38 = vmul.f32 %v511_v20, %v511_v20  ;;  %v517_v0 = vsub.f32 %v1503_v18, %v1490_v4 }
 0x152   : > { %v503_v31 = vsub.f32 %v413_v24, %v1490_v4  ;;  %v602_v40 = vmul.f32 %v502_v23, %v502_v23  ;;  %v530_v56 = vadd.f32 %v529_v44, %v502_v23  ;;  %v649_v60 = vadd.f32 %v648_v47, %v601_v39 }
 0x153   : > { %v417_v32 = vpop.f32.mrf.mxu0  ;;  %v1510_v33 = vpop.f32.mrf.mxu1  ;;  %v612_v39 = vmul.f32 %v512_v21, %v512_v21  ;;  %v615_v47 = vmul.f32 %v515_v57, %v515_v57 }
 0x154   : > { %v504_v36 = vsub.f32 %v417_v32, %v1486_v1  ;;  %v603_v49 = vmul.f32 %v503_v31, %v503_v31  ;;  %v629_v62 = vadd.f32 %v628_v48, %v602_v40  ;;  %v551_v5 = vadd.f32 %v550_v54, %v503_v31 }
 0x155   : > { %v419_v41 = vpop.f32.mrf.mxu0  ;;  %v1513_v42 = vpop.f32.mrf.mxu1  ;;  %v514_v31 = vsub.f32 %v1488_v3, %v1486_v1  ;;  %v516_v40 = vsub.f32 %v1498_v12, %v1486_v1  ;;  %v617_v12 = vmul.f32 %v517_v0, %v517_v0  ;;  %v519_v18 = vsub.f32 %v1510_v33, %v1490_v4 }
 0x156   : > { %v505_v46 = vsub.f32 %v419_v41, %v1490_v4  ;;  %v604_v50 = vmul.f32 %v504_v36, %v504_v36  ;;  %v531_v6 = vadd.f32 %v530_v56, %v504_v36  ;;  %v650_v10 = vadd.f32 %v649_v60, %v603_v49 }
 0x157   : > { %v423_v52 = vpop.f32.mrf.mxu0  ;;  %v467_v59 = vpop.f32.mrf.mxu1  ;;  %v614_v7 = vmul.f32 %v514_v31, %v514_v31  ;;  %v616_v56 = vmul.f32 %v516_v40, %v516_v40  ;;  %v619_v33 = vmul.f32 %v519_v18, %v519_v18 }
 0x158   : > { %v506_v58 = vsub.f32 %v423_v52, %v1486_v1  ;;  %v605_v63 = vmul.f32 %v505_v46, %v505_v46  ;;  %v630_v11 = vadd.f32 %v629_v62, %v604_v50  ;;  %v552_v14 = vadd.f32 %v551_v5, %v505_v46 }
 0x159   : > { %v425_v2 = vpop.f32.mrf.mxu0  ;;  %v471_v19 = vpop.f32.mrf.mxu1  ;;  %v613_v46 = vmul.f32 %v513_v30, %v513_v30 }
 0x15a   : > { %v606_v8 = vmul.f32 %v506_v58, %v506_v58  ;;  %v507_v55 = vsub.f32 %v425_v2, %v1490_v4  ;;  %v532_v15 = vadd.f32 %v531_v6, %v506_v58  ;;  %v651_v22 = vadd.f32 %v650_v10, %v605_v63 }
 0x15b   : > { %v429_v13 = vpop.f32.mrf.mxu0  ;;  %v473_v37 = vpop.f32.mrf.mxu1  ;;  %v520_v58 = vsub.f32 %v1513_v42, %v1486_v1  ;;  %v522_v6 = vsub.f32 %v471_v19, %v1486_v1 }
 0x15c   : > { %v607_v16 = vmul.f32 %v507_v55, %v507_v55  ;;  %v508_v17 = vsub.f32 %v429_v13, %v1486_v1  ;;  %v631_v23 = vadd.f32 %v630_v11, %v606_v8  ;;  %v553_v26 = vadd.f32 %v552_v14, %v507_v55 }
 0x15d   : > { %v431_v24 = vpop.f32.mrf.mxu0  ;;  %v477_v54 = vpop.f32.mrf.mxu1  ;;  %v620_v14 = vmul.f32 %v520_v58, %v520_v58  ;;  %v523_v42 = vsub.f32 %v473_v37, %v1490_v4 }
 0x15e   : > { %v533_v27 = vadd.f32 %v532_v15, %v508_v17  ;;  %v608_v28 = vmul.f32 %v508_v17, %v508_v17  ;;  %v509_v29 = vsub.f32 %v431_v24, %v1490_v4  ;;  %v652_v32 = vadd.f32 %v651_v22, %v607_v16 }
 0x15f   : > { %v524_v8 = vsub.f32 %v477_v54, %v1486_v1  ;;  %v479_v13 = vpop.f32.mrf.mxu1  ;;  %v622_v22 = vmul.f32 %v522_v6, %v522_v6 }
 0x160   : > { %v534_v34 = vadd.f32 %v533_v27, %v510_v45  ;;  %v632_v61 = vadd.f32 %v631_v23, %v608_v28  ;;  %v554_v35 = vadd.f32 %v553_v26, %v509_v29  ;;  %v609_v36 = vmul.f32 %v509_v29, %v509_v29 }
 0x161   : > { %v518_v45 = vsub.f32 %v1507_v25, %v1486_v1  ;;  %v521_v25 = vsub.f32 %v467_v59, %v1490_v4  ;;  %v624_v59 = vmul.f32 %v524_v8, %v524_v8  ;;  %v525_v19 = vsub.f32 %v479_v13, %v1490_v4 }
 0x162   : > { %v535_v41 = vadd.f32 %v534_v34, %v512_v21  ;;  %v633_v43 = vadd.f32 %v632_v61, %v610_v9  ;;  %v555_v3 = vadd.f32 %v554_v35, %v511_v20  ;;  %v653_v44 = vadd.f32 %v652_v32, %v609_v36 }
 0x163   : > { %v618_v5 = vmul.f32 %v518_v45, %v518_v45  ;;  %v621_v21 = vmul.f32 %v521_v25, %v521_v25  ;;  %v623_v27 = vmul.f32 %v523_v42, %v523_v42 }
 0x164   : > { %v634_v48 = vadd.f32 %v633_v43, %v612_v39  ;;  %v556_v49 = vadd.f32 %v555_v3, %v513_v30  ;;  %v654_v50 = vadd.f32 %v653_v44, %v611_v38  ;;  %v536_v52 = vadd.f32 %v535_v41, %v514_v31 }
 0x166   : > { %v655_v60 = vadd.f32 %v654_v50, %v613_v46  ;;  %v537_v62 = vadd.f32 %v536_v52, %v516_v40  ;;  %v635_v63 = vadd.f32 %v634_v48, %v614_v7  ;;  %v557_v2 = vadd.f32 %v556_v49, %v515_v57 }
 0x167   : > { %v625_v57 = vmul.f32 %v525_v19, %v525_v19  ;;  %v1250_v40 = vmov 1966171168  }
 0x168   : > { %v538_v55 = vadd.f32 %v537_v62, %v518_v45  ;;  %v636_v9 = vadd.f32 %v635_v63, %v616_v56  ;;  %v558_v10 = vadd.f32 %v557_v2, %v517_v0  ;;  %v656_v11 = vadd.f32 %v655_v60, %v615_v47 }
 0x169   : > { %v573_v4 = vunpack.c.l.s4 %v1250_v40 }
 0x16a   : > { %v637_v15 = vadd.f32 %v636_v9, %v618_v5  ;;  %v559_v16 = vadd.f32 %v558_v10, %v519_v18  ;;  %v657_v17 = vadd.f32 %v656_v11, %v617_v12  ;;  %v539_v20 = vadd.f32 %v538_v55, %v520_v58  ;;  %v593_v11 = vld [vmem:[%s1435_s14] sm:$0x3] }
 0x16b   : > { %v574_v45 = vunpack.c.0.s8 %v573_v4 }
 0x16c   : > { %v658_v23 = vadd.f32 %v657_v17, %v619_v33  ;;  %v638_v1 = vadd.f32 %v637_v15, %v620_v14  ;;  %v560_v24 = vadd.f32 %v559_v16, %v521_v25  ;;  %v540_v26 = vadd.f32 %v539_v20, %v522_v6 }
 0x16d   : > { %v577_v62 = vsub.s32 %v574_v45, %v1473_v53 }
 0x16e   : > { %v659_v28 = vadd.f32 %v658_v23, %v621_v21  ;;  %v639_v29 = vadd.f32 %v638_v1, %v622_v22  ;;  %v561_v30 = vadd.f32 %v560_v24, %v523_v42  ;;  %v541_v31 = vadd.f32 %v540_v26, %v524_v8  ;;  %v526_v8 = vld [vmem:[%s1433_s7] sm:$0x3] }
 0x170   : > { %v660_v32 = vadd.f32 %v659_v28, %v623_v27  ;;  %v542_v34 = vrot.slane %v541_v31, 4  ;;  %v640_v61 = vadd.f32 %v639_v29, %v624_v59  ;;  %v562_v35 = vadd.f32 %v561_v30, %v525_v19 }
 0x172   : > { %v543_v36 = vadd.f32 %v542_v34, %v541_v31  ;;  %v641_v37 = vrot.slane %v640_v61, 4  ;;  %v563_v38 = vrot.slane %v562_v35, 4  ;;  %v661_v39 = vadd.f32 %v660_v32, %v625_v57 }
 0x174   : > { %v544_v0 = vrot.slane %v543_v36, 2  ;;  %v642_v41 = vadd.f32 %v641_v37, %v640_v61  ;;  %v564_v43 = vadd.f32 %v563_v38, %v562_v35  ;;  %v662_v3 = vrot.slane %v661_v39, 4 }
 0x176   : > { %v545_v44 = vadd.f32 %v544_v0, %v543_v36  ;;  %v643_v46 = vrot.slane %v642_v41, 2  ;;  %v565_v7 = vrot.slane %v564_v43, 2  ;;  %v663_v47 = vadd.f32 %v662_v3, %v661_v39 }
 0x178   : > { %v546_v48 = vrot.slane %v545_v44, 1  ;;  %v644_v49 = vadd.f32 %v643_v46, %v642_v41  ;;  %v566_v50 = vadd.f32 %v565_v7, %v564_v43  ;;  %v664_v52 = vrot.slane %v663_v47, 2 }
 0x17a   : > { %v645_v54 = vrot.slane %v644_v49, 1  ;;  %v567_v56 = vrot.slane %v566_v50, 1  ;;  %v665_v12 = vadd.f32 %v664_v52, %v663_v47  ;;  %v547_v18 = vadd.f32 %v546_v48, %v545_v44 }
 0x17c   : > { %v568_v58 = vadd.f32 %v567_v56, %v566_v50  ;;  %v666_v60 = vrot.slane %v665_v12, 1  ;;  %v646_v63 = vadd.f32 %v645_v54, %v644_v49 }
 0x17e   : > { %v571_v2 = vcombine.low %v547_v18, %v568_v58  ;;  %v667_v5 = vadd.f32 %v666_v60, %v665_v12 }
 0x180   : > { %v670_v25 = vcombine.low %v646_v63, %v667_v5  ;;  %v578_v6 = vrot.slane %v571_v2, %v577_v62 }
 0x182   : > { %v585_v55 = vrot.slane %v578_v6, %v577_v62  ;;  %v677_v9 = vrot.slane %v670_v25, %v577_v62 }
 0x184   : > { %v587_v53 = vadd.f32 %v585_v55, %v526_v8  ;;  %v684_v13 = vrot.slane %v677_v9, %v577_v62 }
 0x186   : > { %592 = vst.msk [vmem:[%s1433_s7] sm:$0x3] %vm1551_vm1, %v587_v53  ;;  %v686_v51 = vadd.f32 %v684_v13, %v593_v11 }
 0x187   : > { %1099 = shalt.err (!%p1096_p7)
}
 0x188   : > { %s1100_s7 = scalar_lea.hbm %s1560_s8, 32  ;;  %s1104_s15 = scalar_lea.hbm %s1693_s5, 64 }
 0x189   : > { %p1101_p9 = scmp.ne.s32.totalorder %s1560_s8, %s1100_s7  ;;  %p1105_p2 = scmp.lt.s32.totalorder %s1560_s8, %s1693_s5 }
 0x18a   : > { %p1106_p4 = scmp.lt.s32.totalorder %s1104_s15, %s1100_s7 }
 0x18b   : > { %p1102_p10 = pnand %p1101_p9, %p1695_p3 }
 0x18c   : > { %p1107_p11 = por %p1106_p4, %p1105_p2 }
 0x18d   : > { %p1103_p12 = pneg %p1102_p10 }
 0x18f   : > { %p1108_p1 = pnand %p1107_p11, %p1103_p12 }
 0x191   : > { %1111 = shalt.err (!%p1108_p1)
}
 0x192   : > { %913 = dma.vmem_to_hbm [thread:$0]  (%p1695_p3), %s1562_s12, 32, %s1560_s8, %s689_s21   ;;  %687 = vst.msk [vmem:[%s1435_s14] sm:$0x3] %vm1551_vm1, %v686_v51 }
 0x193   : > { %s694_s28 = scalar_lea.sflag [#allocation9], %s1430_s2  ;;  %s1112_s30 = scalar_lea.vmem %s1572_s4, 32 }
 0x194   : > { %p1113_p0 = scmp.ne.s32.totalorder %s1572_s4, %s1112_s30  ;;  %s1252_s27 = smov [#allocation8]  }
 0x195   : > { %s1116_s29 = sshll.u32 %s1252_s27, 4  ;;  %s1117_s29 = int_to_ptr.vmem [resolvable:$false] %s1116_s29 }
 0x196   : > { %p1114_p13 = pnand %p1113_p0, %p1695_p3  ;;  %s1118_s7 = scalar_lea.vmem %s1117_s29, 64 }
 0x197   : > { %p1119_p6 = scmp.lt.s32.totalorder %s1572_s4, %s1117_s29  ;;  %p1120_p8 = scmp.lt.s32.totalorder %s1118_s7, %s1112_s30 }
 0x198   : > { %p1115_p5 = pneg %p1114_p13 }
 0x199   : > { %p1121_p7 = por %p1120_p8, %p1119_p6 }
 0x19b   : > { %p1122_p9 = pnand %p1121_p7, %p1115_p5 }
 0x19d   : > { %1125 = shalt.err (!%p1122_p9)
}
 0x19e   : > { %s1126_s14 = scalar_lea.hbm %s1570_s3, 32  ;;  %s1130_s8 = scalar_lea.hbm %s1694_s9, 64 }
 0x19f   : > { %p1127_p10 = scmp.ne.s32.totalorder %s1570_s3, %s1126_s14  ;;  %p1131_p4 = scmp.lt.s32.totalorder %s1570_s3, %s1694_s9 }
 0x1a0   : > { %p1132_p11 = scmp.lt.s32.totalorder %s1130_s8, %s1126_s14 }
 0x1a1   : > { %p1128_p12 = pnand %p1127_p10, %p1695_p3 }
 0x1a2   : > { %p1133_p1 = por %p1132_p11, %p1131_p4 }
 0x1a3   : > { %p1129_p2 = pneg %p1128_p12 }
 0x1a5   : > { %p1134_p0 = pnand %p1133_p1, %p1129_p2 }
 0x1a7   : > { %1137 = shalt.err (!%p1134_p0)
}
 0x1a8   : > { %914 = dma.vmem_to_hbm [thread:$0]  (%p1695_p3), %s1572_s4, 32, %s1570_s3, %s694_s28  }
 0x1a9 PF: > { %s1696_s22 = sld [smem:[#allocation14_spill]]  ;;  %p935_p13 = scmp.ge.s32.totalorder %s1240_s25, 2 }
 0x1aa   : > { %s1697_s15 = sld [smem:[#allocation18_spill]] }
 0x1af   : > { %s734_s10 = sand.u32 1, %s1696_s22  }
 0x1b0   : > { %p1698_p5 = scmp.ne.s32.totalorder %s1697_s15, 0  ;;  %s735_s13 = scalar_lea.sflag [#allocation4], %s734_s10 }
 0x1b2   : > { %p926_p6 = pnand %p935_p13, %p1698_p5 }
 0x1b4   : > { %p927_p8 = pneg %p926_p6 }
 0x1b6   : > { %1191 = dma.done.wait (%p927_p8), %s735_s13, 32  }
 0x1b7   : > { %1193 = vsyncadd (%p927_p8), %s735_s13, 4294967264  ;;  %s744_s30 = scalar_lea.sflag [#allocation9], %s734_s10 }
 0x1b8   : > { %1195 = dma.done.wait (%p927_p8), %s744_s30, 32  }
 0x1b9   : > { %1197 = vsyncadd (%p927_p8), %s744_s30, 4294967264  ;;  %s25_s25 = sadd.s32 1, %s1240_s25   ;;  %s1699_s21 = sld [smem:[#allocation16_spill]] }
 0x1ba   : > { %p22_p7 = scmp.ge.s32.totalorder %s25_s25, 6   ;;  %s1700_s1 = smov %s1711_s18 }
 0x1bb   : > { %s1701_s15 = smov %s1204_s16  ;;  %s1702_s16 = smov %s1208_s17 }
 0x1bc   : > { %s1703_s17 = smov %s1396_s23  ;;  %s1704_s18 = smov %s1216_s19 }
 0x1bd   : > { %s1705_s19 = smov %s1220_s20  ;;  %s1706_s20 = smov %s1399_s6 }
 0x1be   : > { %s1707_s22 = smov %s1236_s24  ;;  %s1708_s23 = smov %s1700_s1 }
 0x1bf   : > { %s1709_s24 = smov %s1715_s26  ;;  %24 = sbr.rel (!%p22_p7) target bundleno = 17 (0x11), region = 102 }
 0x1c4   :  { %749 = vsyncpa [#allocation3], 1 }
 0x1c5   :  { %751 = vsyncpa [#allocation3 + $0x1], 1 }
 0x1c6   :  { %752 = vsyncpa [#allocation6], 1 }
 0x1c7   :  { %753 = vsyncpa [#allocation4], 1 }
 0x1c8   :  { %755 = vsyncpa [#allocation4 + $0x1], 1 }
 0x1c9   :  { %756 = vsyncpa [#allocation9], 1 }
 0x1ca   :  { %758 = vsyncpa [#allocation9 + $0x1], 1 }

</bundles_post_ra>
